<compile_context>
chip_gen: v7x
topology: tpu7x:2x2x1
jax: 0.10.0
libtpu: 0.0.40
codegen_flags: <defaults>
</compile_context>

<pallas_src>
import functools

import jax
import jax.numpy as jnp
from jax.experimental import pallas as pl
from jax.experimental.pallas import tpu as pltpu

_LANE = 128
_VMEM_LIMIT = 32 * 1024 * 1024


def _round_up(x, m):
    return ((x + m - 1) // m) * m


def _pick_tile(n_pad):
    # n_pad is always a multiple of 128; prefer the largest tile that divides it.
    for t in (512, 256, 128):
        if n_pad % t == 0:
            return t
    return n_pad


# ----------------------------------------------------------------------------
# Kernels
# ----------------------------------------------------------------------------
def _gcn_conv_kernel(a_ref, x_ref, w_ref, b_ref, o_ref, acc_ref, *, apply_relu):
    """One (row_block, k_block) step of H = A_hat @ (X @ W) + b [+ ReLU]."""
    k = pl.program_id(1)

    @pl.when(k == 0)
    def _():
        acc_ref[...] = jnp.zeros_like(acc_ref)

    xw = jnp.dot(x_ref[...], w_ref[...], preferred_element_type=jnp.float32)
    acc_ref[...] += jnp.dot(a_ref[...], xw.astype(jnp.bfloat16),
                            preferred_element_type=jnp.float32)

    @pl.when(k == pl.num_programs(1) - 1)
    def _():
        h = acc_ref[...] + b_ref[...]
        if apply_relu:
            h = jnp.maximum(h, 0.0)
        o_ref[...] = h.astype(o_ref.dtype)


def _gcn_conv_project_kernel(a_ref, h_ref, w_ref, b_ref, pw_ref, sd_ref, acc_ref):
    """conv2 + decoder projection: sd = (A_hat @ (H @ W2) + b2) @ [w_src | w_dst].

    z never leaves VMEM; only the (row_tile, 2) projection is written to HBM.
    """
    k = pl.program_id(1)

    @pl.when(k == 0)
    def _():
        acc_ref[...] = jnp.zeros_like(acc_ref)

    hw = jnp.dot(h_ref[...], w_ref[...], preferred_element_type=jnp.float32)
    acc_ref[...] += jnp.dot(a_ref[...], hw.astype(jnp.bfloat16),
                            preferred_element_type=jnp.float32)

    @pl.when(k == pl.num_programs(1) - 1)
    def _():
        z = acc_ref[...] + b_ref[...]                      # (TM, H_pad) f32
        sd_ref[...] = jnp.dot(z.astype(jnp.bfloat16), pw_ref[...],
                              preferred_element_type=jnp.float32)


def _decode_kernel(sd_ref, src_ref, dst_ref, b_ref, o_ref):
    """Per-edge logits for one lane tile of edges.

    fc(concat(z_src, z_dst)) == sd[src, 0] + sd[dst, 1] + b; the endpoint select is a
    vectorized one-hot compare + sublane reduce (no row gathers).
    """
    n_pad = sd_ref.shape[0]
    te = src_ref.shape[1]
    s = sd_ref[:, 0:1]                                                  # (N_pad, 1)
    d = sd_ref[:, 1:2]                                                  # (N_pad, 1)
    node_ids = jax.lax.broadcasted_iota(jnp.int32, (n_pad, te), 0)      # (N_pad, TE)
    sel = (jnp.where(node_ids == src_ref[...], s, 0.0)
           + jnp.where(node_ids == dst_ref[...], d, 0.0))               # (N_pad, TE)
    logits = jnp.sum(sel, axis=0, keepdims=True) + b_ref[0]             # (1, TE)
    o_ref[...] = jax.nn.sigmoid(logits).astype(o_ref.dtype)


# ----------------------------------------------------------------------------
# Graph preprocessing (depends only on edge_index; build once, reuse)
# ----------------------------------------------------------------------------
def build_normalized_adjacency(edge_index, num_nodes):
    """Dense gcn_norm adjacency, zero-padded to a multiple of 128, bf16."""
    src, dst = edge_index[0], edge_index[1]
    adj = jnp.zeros((num_nodes, num_nodes), jnp.float32).at[dst, src].add(1.0)
    # add_remaining_self_loops: self-loop weight 1 only for nodes lacking one.
    diag = jnp.diagonal(adj)
    adj = adj + jnp.diag(jnp.where(diag > 0, 0.0, 1.0))
    deg = adj.sum(axis=1)
    d_inv_sqrt = jnp.where(deg > 0, jax.lax.rsqrt(deg), 0.0)
    a_hat = adj * d_inv_sqrt[:, None] * d_inv_sqrt[None, :]
    n_pad = _round_up(num_nodes, _LANE)
    out = jnp.zeros((n_pad, n_pad), jnp.bfloat16)
    return out.at[:num_nodes, :num_nodes].set(a_hat.astype(jnp.bfloat16))


# ----------------------------------------------------------------------------
# Forward wrapper
# ----------------------------------------------------------------------------
def gcn_link_predictor_forward(x, edge_index, a_hat_pad, params):
    n, f_in = x.shape
    e = edge_index.shape[1]
    hidden = params["w1"].shape[1]
    n_pad = a_hat_pad.shape[0]
    tile = _pick_tile(n_pad)
    h_pad = _round_up(hidden, _LANE)
    grid = (n_pad // tile, n_pad // tile)

    # ---- pad / cast operands (zero-padding is exact; see kernel header) ----
    x_p = jnp.zeros((n_pad, f_in), jnp.bfloat16).at[:n].set(x.astype(jnp.bfloat16))
    w1 = jnp.zeros((f_in, h_pad), jnp.bfloat16).at[:, :hidden].set(
        params["w1"].astype(jnp.bfloat16))
    b1 = jnp.zeros((1, h_pad), jnp.float32).at[0, :hidden].set(params["b1"])
    w2 = jnp.zeros((h_pad, h_pad), jnp.bfloat16).at[:hidden, :hidden].set(
        params["w2"].astype(jnp.bfloat16))
    b2 = jnp.zeros((1, h_pad), jnp.float32).at[0, :hidden].set(params["b2"])
    # fc weight (2H, 1) split into src / dst halves, stacked as two columns.
    pw = jnp.zeros((h_pad, 2), jnp.bfloat16)
    pw = pw.at[:hidden, 0].set(params["fc_w"][:hidden, 0].astype(jnp.bfloat16))
    pw = pw.at[:hidden, 1].set(params["fc_w"][hidden:, 0].astype(jnp.bfloat16))
    fc_b = params["fc_b"].astype(jnp.float32).reshape((1,))

    conv_cp = pltpu.CompilerParams(
        dimension_semantics=("parallel", "arbitrary"),
        vmem_limit_bytes=_VMEM_LIMIT)

    # ---- conv1: H = relu(A_hat @ (X @ W1) + b1) ----
    h1 = pl.pallas_call(
        functools.partial(_gcn_conv_kernel, apply_relu=True),
        grid=grid,
        in_specs=[
            pl.BlockSpec((tile, tile), lambda i, k: (i, k)),
            pl.BlockSpec((tile, f_in), lambda i, k: (k, 0)),
            pl.BlockSpec((f_in, h_pad), lambda i, k: (0, 0)),
            pl.BlockSpec((1, h_pad), lambda i, k: (0, 0)),
        ],
        out_specs=pl.BlockSpec((tile, h_pad), lambda i, k: (i, 0)),
        out_shape=jax.ShapeDtypeStruct((n_pad, h_pad), jnp.bfloat16),
        scratch_shapes=[pltpu.VMEM((tile, h_pad), jnp.float32)],
        compiler_params=conv_cp,
    )(a_hat_pad, x_p, w1, b1)

    # ---- conv2 + decoder projection: sd = (A_hat @ (H @ W2) + b2) @ [w_src|w_dst] ----
    sd = pl.pallas_call(
        _gcn_conv_project_kernel,
        grid=grid,
        in_specs=[
            pl.BlockSpec((tile, tile), lambda i, k: (i, k)),
            pl.BlockSpec((tile, h_pad), lambda i, k: (k, 0)),
            pl.BlockSpec((h_pad, h_pad), lambda i, k: (0, 0)),
            pl.BlockSpec((1, h_pad), lambda i, k: (0, 0)),
            pl.BlockSpec((h_pad, 2), lambda i, k: (0, 0)),
        ],
        out_specs=pl.BlockSpec((tile, 2), lambda i, k: (i, 0)),
        out_shape=jax.ShapeDtypeStruct((n_pad, 2), jnp.float32),
        scratch_shapes=[pltpu.VMEM((tile, h_pad), jnp.float32)],
        compiler_params=conv_cp,
    )(a_hat_pad, h1, w2, b2, pw)

    # ---- decoder, tiled over edges on the lane axis ----
    e_pad = _round_up(e, _LANE)
    te = 512 if e_pad % 512 == 0 else _LANE
    # Padded edge slots point at index n_pad (matches no node -> sigmoid(b), discarded).
    src = jnp.full((1, e_pad), n_pad, jnp.int32).at[0, :e].set(
        edge_index[0].astype(jnp.int32))
    dst = jnp.full((1, e_pad), n_pad, jnp.int32).at[0, :e].set(
        edge_index[1].astype(jnp.int32))

    probs = pl.pallas_call(
        _decode_kernel,
        grid=(e_pad // te,),
        in_specs=[
            pl.BlockSpec((n_pad, 2), lambda eb: (0, 0)),
            pl.BlockSpec((1, te), lambda eb: (0, eb)),
            pl.BlockSpec((1, te), lambda eb: (0, eb)),
            pl.BlockSpec(memory_space=pltpu.MemorySpace.SMEM),
        ],
        out_specs=pl.BlockSpec((1, te), lambda eb: (0, eb)),
        out_shape=jax.ShapeDtypeStruct((1, e_pad), jnp.float32),
        compiler_params=pltpu.CompilerParams(
            dimension_semantics=("parallel",),
            vmem_limit_bytes=_VMEM_LIMIT),
    )(sd, src, dst, fc_b)

    return probs[0, :e]            # matches .squeeze() in the torch module


# ----------------------------------------------------------------------------
# Deterministic parameter construction (synthetic init, no checkpoint)
# ----------------------------------------------------------------------------
def make_params(num_node_features, hidden_dim, key):
    k1, k2, k3 = jax.random.split(key, 3)
    return {
        "w1": 0.1 * jax.random.normal(k1, (num_node_features, hidden_dim), jnp.float32),
        "b1": jnp.zeros((hidden_dim,), jnp.float32),
        "w2": 0.1 * jax.random.normal(k2, (hidden_dim, hidden_dim), jnp.float32),
        "b2": jnp.zeros((hidden_dim,), jnp.float32),
        # torch.nn.Linear(hidden*2, 1): weight (1, 2H) stored transposed, bias (1,)
        "fc_w": 0.1 * jax.random.normal(k3, (2 * hidden_dim, 1), jnp.float32),
        "fc_b": jnp.zeros((1,), jnp.float32),
    }


if __name__ == "__main__":
    NUM_NODES = 16
    NUM_NODE_FEATURES = 4
    HIDDEN_DIM = 32
    NUM_EDGES = 8

    root = jax.random.PRNGKey(0)
    kx, ke, kp = jax.random.split(root, 3)

    x = jax.random.normal(kx, (NUM_NODES, NUM_NODE_FEATURES), jnp.float32)
    edge_index = jax.random.randint(ke, (2, NUM_EDGES), 0, NUM_NODES, jnp.int32)
    params = make_params(NUM_NODE_FEATURES, HIDDEN_DIM, kp)

    # A_hat depends only on the graph: built once, outside the hot forward path.
    a_hat_pad = build_normalized_adjacency(edge_index, NUM_NODES)

    fwd = jax.jit(gcn_link_predictor_forward)
    probs = fwd(x, edge_index, a_hat_pad, params)
    jax.block_until_ready(probs)

    assert probs.shape == (NUM_EDGES,)
    assert bool(jnp.all(jnp.isfinite(probs)))
    assert bool(jnp.all((probs >= 0.0) & (probs <= 1.0)))
    print("KERNEL_OK")
</pallas_src>

<mosaic_0001>
module attributes {stable_mosaic.version = 11 : i64} {
  func.func @_gcn_conv_kernel(%arg0: i32, %arg1: i32, %arg2: memref<128x128xbf16, #tpu.memory_space<vmem>>, %arg3: memref<128x4xbf16, #tpu.memory_space<vmem>>, %arg4: memref<4x128xbf16, #tpu.memory_space<vmem>>, %arg5: memref<1x128xf32, #tpu.memory_space<vmem>>, %arg6: memref<128x128xbf16, #tpu.memory_space<vmem>>, %arg7: memref<128x128xf32, #tpu.memory_space<vmem>>) attributes {dimension_semantics = [#tpu.dimension_semantics<parallel>, #tpu.dimension_semantics<arbitrary>], iteration_bounds = array<i64: 1, 1>, scalar_prefetch = 0 : i64, scratch_operands = 1 : i64, tpu.core_type = #tpu.core_type<tc>, window_params = [{transform_indices = @transform_0, window_bounds = array<i64: 128, 128>}, {transform_indices = @transform_1, window_bounds = array<i64: 128, 4>}, {pipeline_mode = #tpu.pipeline_mode<synchronous>, transform_indices = @transform_2, window_bounds = array<i64: 4, 128>}, {pipeline_mode = #tpu.pipeline_mode<synchronous>, transform_indices = @transform_3, window_bounds = array<i64: 1, 128>}, {transform_indices = @transform_4, window_bounds = array<i64: 128, 128>}]} {
    %c0_i32 = arith.constant 0 : i32
    %0 = arith.cmpi eq, %arg1, %c0_i32 : i32
    %1 = arith.extui %0 : i1 to i32
    %c0_i32_0 = arith.constant 0 : i32
    %2 = arith.cmpi ne, %1, %c0_i32_0 : i32
    scf.if %2 {
      %cst_13 = arith.constant 0.000000e+00 : f32
      %15 = vector.broadcast %cst_13 : f32 to vector<128x128xf32>
      %c0_14 = arith.constant 0 : index
      %c0_15 = arith.constant 0 : index
      %16 = vector.load %arg7[%c0_14, %c0_15] : memref<128x128xf32, #tpu.memory_space<vmem>>, vector<128x128xf32>
      tpu.vector_store %arg7[%c0_14, %c0_15], %15 {strides = array<i32>} : memref<128x128xf32, #tpu.memory_space<vmem>>, vector<128x128xf32>,
    } else {
    }
    %c0 = arith.constant 0 : index
    %c0_1 = arith.constant 0 : index
    %3 = vector.load %arg3[%c0, %c0_1] : memref<128x4xbf16, #tpu.memory_space<vmem>>, vector<128x4xbf16>
    %c0_2 = arith.constant 0 : index
    %c0_3 = arith.constant 0 : index
    %4 = vector.load %arg4[%c0_2, %c0_3] : memref<4x128xbf16, #tpu.memory_space<vmem>>, vector<4x128xbf16>
    %cst = arith.constant dense<0.000000e+00> : vector<128x128xf32>
    %5 = tpu.matmul %3, %4, %cst {dimension_numbers = #tpu.dot_dimension_numbers<[1], [0], [0], [1], [0, 0, 1, 1], [], []>} : vector<128x4xbf16>, vector<4x128xbf16>, vector<128x128xf32> -> vector<128x128xf32>
    %c0_4 = arith.constant 0 : index
    %c0_5 = arith.constant 0 : index
    %6 = vector.load %arg7[%c0_4, %c0_5] : memref<128x128xf32, #tpu.memory_space<vmem>>, vector<128x128xf32>
    %c0_6 = arith.constant 0 : index
    %c0_7 = arith.constant 0 : index
    %7 = vector.load %arg2[%c0_6, %c0_7] : memref<128x128xbf16, #tpu.memory_space<vmem>>, vector<128x128xbf16>
    %8 = arith.truncf %5 : vector<128x128xf32> to vector<128x128xbf16>
    %cst_8 = arith.constant dense<0.000000e+00> : vector<128x128xf32>
    %9 = tpu.matmul %7, %8, %cst_8 {dimension_numbers = #tpu.dot_dimension_numbers<[1], [0], [0], [1], [0, 0, 1, 1], [], []>} : vector<128x128xbf16>, vector<128x128xbf16>, vector<128x128xf32> -> vector<128x128xf32>
    %10 = arith.addf %6, %9 : vector<128x128xf32>
    %c0_9 = arith.constant 0 : index
    %c0_10 = arith.constant 0 : index
    %11 = vector.load %arg7[%c0_9, %c0_10] : memref<128x128xf32, #tpu.memory_space<vmem>>, vector<128x128xf32>
    tpu.vector_store %arg7[%c0_9, %c0_10], %10 {strides = array<i32>} : memref<128x128xf32, #tpu.memory_space<vmem>>, vector<128x128xf32>,
    %c0_i32_11 = arith.constant 0 : i32
    %12 = arith.cmpi eq, %arg1, %c0_i32_11 : i32
    %13 = arith.extui %12 : i1 to i32
    %c0_i32_12 = arith.constant 0 : i32
    %14 = arith.cmpi ne, %13, %c0_i32_12 : i32
    scf.if %14 {
      %c0_13 = arith.constant 0 : index
      %c0_14 = arith.constant 0 : index
      %15 = vector.load %arg7[%c0_13, %c0_14] : memref<128x128xf32, #tpu.memory_space<vmem>>, vector<128x128xf32>
      %c0_15 = arith.constant 0 : index
      %c0_16 = arith.constant 0 : index
      %16 = vector.load %arg5[%c0_15, %c0_16] : memref<1x128xf32, #tpu.memory_space<vmem>>, vector<1x128xf32>
      %17 = vector.broadcast %16 : vector<1x128xf32> to vector<128x128xf32>
      %18 = arith.addf %15, %17 : vector<128x128xf32>
      %cst_17 = arith.constant 0.000000e+00 : f32
      %19 = vector.broadcast %cst_17 : f32 to vector<128x128xf32>
      %20 = arith.maximumf %18, %19 : vector<128x128xf32>
      %21 = arith.truncf %20 : vector<128x128xf32> to vector<128x128xbf16>
      %c0_18 = arith.constant 0 : index
      %c0_19 = arith.constant 0 : index
      %22 = vector.load %arg6[%c0_18, %c0_19] : memref<128x128xbf16, #tpu.memory_space<vmem>>, vector<128x128xbf16>
      tpu.vector_store %arg6[%c0_18, %c0_19], %21 {strides = array<i32>} : memref<128x128xbf16, #tpu.memory_space<vmem>>, vector<128x128xbf16>,
    } else {
    }
    return
  }
  func.func @transform_0(%arg0: i32, %arg1: i32) -> (i32, i32) {
    %c0_i32 = arith.constant 0 : i32
    return %arg0, %arg1 : i32, i32
  }
  func.func @transform_1(%arg0: i32, %arg1: i32) -> (i32, i32) {
    %c0_i32 = arith.constant 0 : i32
    %c0_i32_0 = arith.constant 0 : i32
    return %arg1, %c0_i32 : i32, i32
  }
  func.func @transform_2(%arg0: i32, %arg1: i32) -> (i32, i32) {
    %c0_i32 = arith.constant 0 : i32
    %c0_i32_0 = arith.constant 0 : i32
    %c0_i32_1 = arith.constant 0 : i32
    return %c0_i32, %c0_i32_0 : i32, i32
  }
  func.func @transform_3(%arg0: i32, %arg1: i32) -> (i32, i32) {
    %c0_i32 = arith.constant 0 : i32
    %c0_i32_0 = arith.constant 0 : i32
    %c0_i32_1 = arith.constant 0 : i32
    return %c0_i32, %c0_i32_0 : i32, i32
  }
  func.func @transform_4(%arg0: i32, %arg1: i32) -> (i32, i32) {
    %c0_i32 = arith.constant 0 : i32
    %c0_i32_0 = arith.constant 0 : i32
    return %arg0, %c0_i32 : i32, i32
  }
}

module attributes {stable_mosaic.version = 11 : i64} {
  func.func @_gcn_conv_project_kernel(%arg0: i32, %arg1: i32, %arg2: memref<128x128xbf16, #tpu.memory_space<vmem>>, %arg3: memref<128x128xbf16, #tpu.memory_space<vmem>>, %arg4: memref<128x128xbf16, #tpu.memory_space<vmem>>, %arg5: memref<1x128xf32, #tpu.memory_space<vmem>>, %arg6: memref<128x2xbf16, #tpu.memory_space<vmem>>, %arg7: memref<128x2xf32, #tpu.memory_space<vmem>>, %arg8: memref<128x128xf32, #tpu.memory_space<vmem>>) attributes {dimension_semantics = [#tpu.dimension_semantics<parallel>, #tpu.dimension_semantics<arbitrary>], iteration_bounds = array<i64: 1, 1>, scalar_prefetch = 0 : i64, scratch_operands = 1 : i64, tpu.core_type = #tpu.core_type<tc>, window_params = [{transform_indices = @transform_0, window_bounds = array<i64: 128, 128>}, {transform_indices = @transform_1, window_bounds = array<i64: 128, 128>}, {pipeline_mode = #tpu.pipeline_mode<synchronous>, transform_indices = @transform_2, window_bounds = array<i64: 128, 128>}, {pipeline_mode = #tpu.pipeline_mode<synchronous>, transform_indices = @transform_3, window_bounds = array<i64: 1, 128>}, {pipeline_mode = #tpu.pipeline_mode<synchronous>, transform_indices = @transform_4, window_bounds = array<i64: 128, 2>}, {transform_indices = @transform_5, window_bounds = array<i64: 128, 2>}]} {
    %c0_i32 = arith.constant 0 : i32
    %0 = arith.cmpi eq, %arg1, %c0_i32 : i32
    %1 = arith.extui %0 : i1 to i32
    %c0_i32_0 = arith.constant 0 : i32
    %2 = arith.cmpi ne, %1, %c0_i32_0 : i32
    scf.if %2 {
      %cst_13 = arith.constant 0.000000e+00 : f32
      %15 = vector.broadcast %cst_13 : f32 to vector<128x128xf32>
      %c0_14 = arith.constant 0 : index
      %c0_15 = arith.constant 0 : index
      %16 = vector.load %arg8[%c0_14, %c0_15] : memref<128x128xf32, #tpu.memory_space<vmem>>, vector<128x128xf32>
      tpu.vector_store %arg8[%c0_14, %c0_15], %15 {strides = array<i32>} : memref<128x128xf32, #tpu.memory_space<vmem>>, vector<128x128xf32>,
    } else {
    }
    %c0 = arith.constant 0 : index
    %c0_1 = arith.constant 0 : index
    %3 = vector.load %arg3[%c0, %c0_1] : memref<128x128xbf16, #tpu.memory_space<vmem>>, vector<128x128xbf16>
    %c0_2 = arith.constant 0 : index
    %c0_3 = arith.constant 0 : index
    %4 = vector.load %arg4[%c0_2, %c0_3] : memref<128x128xbf16, #tpu.memory_space<vmem>>, vector<128x128xbf16>
    %cst = arith.constant dense<0.000000e+00> : vector<128x128xf32>
    %5 = tpu.matmul %3, %4, %cst {dimension_numbers = #tpu.dot_dimension_numbers<[1], [0], [0], [1], [0, 0, 1, 1], [], []>} : vector<128x128xbf16>, vector<128x128xbf16>, vector<128x128xf32> -> vector<128x128xf32>
    %c0_4 = arith.constant 0 : index
    %c0_5 = arith.constant 0 : index
    %6 = vector.load %arg8[%c0_4, %c0_5] : memref<128x128xf32, #tpu.memory_space<vmem>>, vector<128x128xf32>
    %c0_6 = arith.constant 0 : index
    %c0_7 = arith.constant 0 : index
    %7 = vector.load %arg2[%c0_6, %c0_7] : memref<128x128xbf16, #tpu.memory_space<vmem>>, vector<128x128xbf16>
    %8 = arith.truncf %5 : vector<128x128xf32> to vector<128x128xbf16>
    %cst_8 = arith.constant dense<0.000000e+00> : vector<128x128xf32>
    %9 = tpu.matmul %7, %8, %cst_8 {dimension_numbers = #tpu.dot_dimension_numbers<[1], [0], [0], [1], [0, 0, 1, 1], [], []>} : vector<128x128xbf16>, vector<128x128xbf16>, vector<128x128xf32> -> vector<128x128xf32>
    %10 = arith.addf %6, %9 : vector<128x128xf32>
    %c0_9 = arith.constant 0 : index
    %c0_10 = arith.constant 0 : index
    %11 = vector.load %arg8[%c0_9, %c0_10] : memref<128x128xf32, #tpu.memory_space<vmem>>, vector<128x128xf32>
    tpu.vector_store %arg8[%c0_9, %c0_10], %10 {strides = array<i32>} : memref<128x128xf32, #tpu.memory_space<vmem>>, vector<128x128xf32>,
    %c0_i32_11 = arith.constant 0 : i32
    %12 = arith.cmpi eq, %arg1, %c0_i32_11 : i32
    %13 = arith.extui %12 : i1 to i32
    %c0_i32_12 = arith.constant 0 : i32
    %14 = arith.cmpi ne, %13, %c0_i32_12 : i32
    scf.if %14 {
      %c0_13 = arith.constant 0 : index
      %c0_14 = arith.constant 0 : index
      %15 = vector.load %arg8[%c0_13, %c0_14] : memref<128x128xf32, #tpu.memory_space<vmem>>, vector<128x128xf32>
      %c0_15 = arith.constant 0 : index
      %c0_16 = arith.constant 0 : index
      %16 = vector.load %arg5[%c0_15, %c0_16] : memref<1x128xf32, #tpu.memory_space<vmem>>, vector<1x128xf32>
      %17 = vector.broadcast %16 : vector<1x128xf32> to vector<128x128xf32>
      %18 = arith.addf %15, %17 : vector<128x128xf32>
      %19 = arith.truncf %18 : vector<128x128xf32> to vector<128x128xbf16>
      %c0_17 = arith.constant 0 : index
      %c0_18 = arith.constant 0 : index
      %20 = vector.load %arg6[%c0_17, %c0_18] : memref<128x2xbf16, #tpu.memory_space<vmem>>, vector<128x2xbf16>
      %cst_19 = arith.constant dense<0.000000e+00> : vector<128x2xf32>
      %21 = tpu.matmul %19, %20, %cst_19 {dimension_numbers = #tpu.dot_dimension_numbers<[1], [0], [0], [1], [0, 0, 1, 1], [], []>} : vector<128x128xbf16>, vector<128x2xbf16>, vector<128x2xf32> -> vector<128x2xf32>
      %c0_20 = arith.constant 0 : index
      %c0_21 = arith.constant 0 : index
      %22 = vector.load %arg7[%c0_20, %c0_21] : memref<128x2xf32, #tpu.memory_space<vmem>>, vector<128x2xf32>
      tpu.vector_store %arg7[%c0_20, %c0_21], %21 {strides = array<i32>} : memref<128x2xf32, #tpu.memory_space<vmem>>, vector<128x2xf32>,
    } else {
    }
    return
  }
  func.func @transform_0(%arg0: i32, %arg1: i32) -> (i32, i32) {
    %c0_i32 = arith.constant 0 : i32
    return %arg0, %arg1 : i32, i32
  }
  func.func @transform_1(%arg0: i32, %arg1: i32) -> (i32, i32) {
    %c0_i32 = arith.constant 0 : i32
    %c0_i32_0 = arith.constant 0 : i32
    return %arg1, %c0_i32 : i32, i32
  }
  func.func @transform_2(%arg0: i32, %arg1: i32) -> (i32, i32) {
    %c0_i32 = arith.constant 0 : i32
    %c0_i32_0 = arith.constant 0 : i32
    %c0_i32_1 = arith.constant 0 : i32
    return %c0_i32, %c0_i32_0 : i32, i32
  }
  func.func @transform_3(%arg0: i32, %arg1: i32) -> (i32, i32) {
    %c0_i32 = arith.constant 0 : i32
    %c0_i32_0 = arith.constant 0 : i32
    %c0_i32_1 = arith.constant 0 : i32
    return %c0_i32, %c0_i32_0 : i32, i32
  }
  func.func @transform_4(%arg0: i32, %arg1: i32) -> (i32, i32) {
    %c0_i32 = arith.constant 0 : i32
    %c0_i32_0 = arith.constant 0 : i32
    %c0_i32_1 = arith.constant 0 : i32
    return %c0_i32, %c0_i32_0 : i32, i32
  }
  func.func @transform_5(%arg0: i32, %arg1: i32) -> (i32, i32) {
    %c0_i32 = arith.constant 0 : i32
    %c0_i32_0 = arith.constant 0 : i32
    return %arg0, %c0_i32 : i32, i32
  }
}

module attributes {stable_mosaic.version = 11 : i64} {
  func.func @_decode_kernel(%arg0: i32, %arg1: memref<128x2xf32, #tpu.memory_space<vmem>>, %arg2: memref<1x128xi32, #tpu.memory_space<vmem>>, %arg3: memref<1x128xi32, #tpu.memory_space<vmem>>, %arg4: memref<1xf32, #tpu.memory_space<smem>>, %arg5: memref<1x128xf32, #tpu.memory_space<vmem>>) attributes {dimension_semantics = [#tpu.dimension_semantics<parallel>], iteration_bounds = array<i64: 1>, scalar_prefetch = 0 : i64, scratch_operands = 0 : i64, tpu.core_type = #tpu.core_type<tc>, window_params = [{pipeline_mode = #tpu.pipeline_mode<synchronous>, transform_indices = @transform_0, window_bounds = array<i64: 128, 2>}, {transform_indices = @transform_1, window_bounds = array<i64: 1, 128>}, {transform_indices = @transform_2, window_bounds = array<i64: 1, 128>}, {transform_indices = @transform_3, window_bounds = array<i64: 1>}, {transform_indices = @transform_4, window_bounds = array<i64: 1, 128>}]} {
    %c0 = arith.constant 0 : index
    %c0_0 = arith.constant 0 : index
    %0 = vector.load %arg1[%c0, %c0_0] : memref<128x2xf32, #tpu.memory_space<vmem>>, vector<128x1xf32>
    %c0_1 = arith.constant 0 : index
    %c1 = arith.constant 1 : index
    %1 = vector.load %arg1[%c0_1, %c1] : memref<128x2xf32, #tpu.memory_space<vmem>>, vector<128x1xf32>
    %2 = tpu.iota {dimensions = array<i32: 0>} : vector<128x128xi32>
    %c0_2 = arith.constant 0 : index
    %c0_3 = arith.constant 0 : index
    %3 = vector.load %arg2[%c0_2, %c0_3] : memref<1x128xi32, #tpu.memory_space<vmem>>, vector<1x128xi32>
    %4 = vector.broadcast %3 : vector<1x128xi32> to vector<128x128xi32>
    %5 = arith.cmpi eq, %2, %4 : vector<128x128xi32>
    %cst = arith.constant 0.000000e+00 : f32
    %6 = vector.shape_cast %0 : vector<128x1xf32> to vector<128x1xf32>
    %7 = vector.broadcast %6 : vector<128x1xf32> to vector<128x128xf32>
    %8 = vector.broadcast %cst : f32 to vector<128x128xf32>
    %9 = arith.select %5, %7, %8 : vector<128x128xi1>, vector<128x128xf32>
    %c0_4 = arith.constant 0 : index
    %c0_5 = arith.constant 0 : index
    %10 = vector.load %arg3[%c0_4, %c0_5] : memref<1x128xi32, #tpu.memory_space<vmem>>, vector<1x128xi32>
    %11 = vector.broadcast %10 : vector<1x128xi32> to vector<128x128xi32>
    %12 = arith.cmpi eq, %2, %11 : vector<128x128xi32>
    %cst_6 = arith.constant 0.000000e+00 : f32
    %13 = vector.shape_cast %1 : vector<128x1xf32> to vector<128x1xf32>
    %14 = vector.broadcast %13 : vector<128x1xf32> to vector<128x128xf32>
    %15 = vector.broadcast %cst_6 : f32 to vector<128x128xf32>
    %16 = arith.select %12, %14, %15 : vector<128x128xi1>, vector<128x128xf32>
    %17 = arith.addf %9, %16 : vector<128x128xf32>
    %cst_7 = arith.constant dense<0.000000e+00> : vector<128xf32>
    %18 = vector.multi_reduction <add>, %17, %cst_7 [0] : vector<128x128xf32> to vector<128xf32>
    %19 = vector.shape_cast %18 : vector<128xf32> to vector<1x128xf32>
    %c0_8 = arith.constant 0 : index
    %20 = memref.load %arg4[%c0_8] : memref<1xf32, #tpu.memory_space<smem>>
    %21 = vector.broadcast %20 : f32 to vector<1x128xf32>
    %22 = arith.addf %19, %21 : vector<1x128xf32>
    %23 = arith.negf %22 : vector<1x128xf32>
    %24 = math.exp %23 : vector<1x128xf32>
    %cst_9 = arith.constant 1.000000e+00 : f32
    %25 = vector.broadcast %cst_9 : f32 to vector<1x128xf32>
    %26 = arith.addf %25, %24 : vector<1x128xf32>
    %27 = arith.divf %25, %26 : vector<1x128xf32>
    %c0_10 = arith.constant 0 : index
    %c0_11 = arith.constant 0 : index
    %28 = vector.load %arg5[%c0_10, %c0_11] : memref<1x128xf32, #tpu.memory_space<vmem>>, vector<1x128xf32>
    tpu.vector_store %arg5[%c0_10, %c0_11], %27 {strides = array<i32>} : memref<1x128xf32, #tpu.memory_space<vmem>>, vector<1x128xf32>,
    return
  }
  func.func @transform_0(%arg0: i32) -> (i32, i32) {
    %c0_i32 = arith.constant 0 : i32
    %c0_i32_0 = arith.constant 0 : i32
    %c0_i32_1 = arith.constant 0 : i32
    return %c0_i32, %c0_i32_0 : i32, i32
  }
  func.func @transform_1(%arg0: i32) -> (i32, i32) {
    %c0_i32 = arith.constant 0 : i32
    %c0_i32_0 = arith.constant 0 : i32
    return %c0_i32, %arg0 : i32, i32
  }
  func.func @transform_2(%arg0: i32) -> (i32, i32) {
    %c0_i32 = arith.constant 0 : i32
    %c0_i32_0 = arith.constant 0 : i32
    return %c0_i32, %arg0 : i32, i32
  }
  func.func @transform_3(%arg0: i32) -> i32 {
    %c0_i32 = arith.constant 0 : i32
    %c0_i32_0 = arith.constant 0 : i32
    return %c0_i32 : i32
  }
  func.func @transform_4(%arg0: i32) -> (i32, i32) {
    %c0_i32 = arith.constant 0 : i32
    %c0_i32_0 = arith.constant 0 : i32
    return %c0_i32, %arg0 : i32, i32
  }
}

</mosaic_0001>

<bundles_post_ra>
// kernel: gcn_link_predictor_forward.5
= control target key start
LH: loop header
LB: loop body
LE: loop exit
PB: predicated region body
PF: predicated region fallthrough
CT: control target
= control target key end

     0   :  { %v332_v0 = vmov 1   ;;  %v333_v1 = vmov 0   ;;  %v34_v26 = vlaneseq  ;;  %s474_s0 = inlined_call_operand.vmem [shape: f32[128,2], index: 0, kind: input, shape index: {}]   ;;  %s475_s2 = inlined_call_operand.vmem [shape: s32[1,128], index: 2, kind: input, shape index: {}]   ;;  %s476_s1 = inlined_call_operand.vmem [shape: s32[1,128], index: 1, kind: input, shape index: {}]   ;;  %s477_s3 = inlined_call_operand.<no memory space> [shape: f32[1], index: 3, kind: input, shape index: {}]   ;;  %s478_s4 = inlined_call_operand.vmem [shape: f32[1,128], index: 4, kind: output, shape index: {}]  }
   0x1   :  { %326 = vset.pattern.permute.xlu1 %v332_v0  ;;  %325 = vset.pattern.permute.xlu0 %v333_v1  ;;  %v18_v2 = vld [vmem:[%s474_s0] sm:$0xff]  ;;  %v19_v3 = vld [vmem:[%s474_s0 + $0x8] sm:$0xff]  ;;  %v20_v4 = vld [vmem:[%s474_s0 + $0x10] sm:$0xff] }
   0x2   :  { %190 = vperm.xlu1 %326, %v18_v2   ;;  %74 = vperm.xlu0 %325, %v18_v2   ;;  %v21_v5 = vld [vmem:[%s474_s0 + $0x18] sm:$0xff]  ;;  %v22_v6 = vld [vmem:[%s474_s0 + $0x20] sm:$0xff]  ;;  %v23_v7 = vld [vmem:[%s474_s0 + $0x28] sm:$0xff]  ;;  %v407_v29 = vshrl.u32 %v34_v26, 7 }
   0x3   :  { %v24_v8 = vld [vmem:[%s474_s0 + $0x30] sm:$0xff]  ;;  %v25_v9 = vld [vmem:[%s474_s0 + $0x38] sm:$0xff]  ;;  %v26_v10 = vld [vmem:[%s474_s0 + $0x40] sm:$0xff] }
   0x4   :  { %v27_v11 = vld [vmem:[%s474_s0 + $0x48] sm:$0xff]  ;;  %v28_v12 = vld [vmem:[%s474_s0 + $0x50] sm:$0xff]  ;;  %v29_v13 = vld [vmem:[%s474_s0 + $0x58] sm:$0xff]  ;;  %v36_v32 = vadd.s32 8, %v407_v29  ;;  %v37_v34 = vadd.s32 16, %v407_v29  ;;  %v38_v38 = vadd.s32 24, %v407_v29 }
   0x5   :  { %v30_v14 = vld [vmem:[%s474_s0 + $0x60] sm:$0xff]  ;;  %v31_v15 = vld [vmem:[%s474_s0 + $0x68] sm:$0xff]  ;;  %v32_v16 = vld [vmem:[%s474_s0 + $0x70] sm:$0xff]  ;;  %v39_v39 = vadd.s32 32, %v407_v29  ;;  %v40_v44 = vadd.s32 40, %v407_v29  ;;  %v41_v45 = vadd.s32 48, %v407_v29 }
   0x6   :  { %194 = vperm.xlu1 %326, %v19_v3   ;;  %79 = vperm.xlu0 %325, %v19_v3   ;;  %v33_v17 = vld [vmem:[%s474_s0 + $0x78] sm:$0xff]  ;;  %v413_v33 = vld [vmem:[%s475_s2] ss:$0 sm:$0xff]  ;;  %v42_v55 = vadd.s32 56, %v407_v29  ;;  %v43_v62 = vadd.s32 64, %v407_v29 }
   0x7   :  { %v419_v37 = vld [vmem:[%s476_s1] ss:$0 sm:$0xff]  ;;  %vm174_vm0 = vcmp.eq.s32.totalorder %v36_v32, %v413_v33  ;;  %vm173_vm2 = vcmp.eq.s32.totalorder %v407_v29, %v413_v33  ;;  %vm175_vm4 = vcmp.eq.s32.totalorder %v37_v34, %v413_v33  ;;  %vm176_vm6 = vcmp.eq.s32.totalorder %v38_v38, %v413_v33 }
   0x8   :  { %vm57_vm1 = vcmp.eq.s32.totalorder %v36_v32, %v419_v37  ;;  %vm56_vm3 = vcmp.eq.s32.totalorder %v407_v29, %v419_v37  ;;  %vm58_vm5 = vcmp.eq.s32.totalorder %v37_v34, %v419_v37  ;;  %vm59_vm7 = vcmp.eq.s32.totalorder %v38_v38, %v419_v37 }
   0x9   :  { %vm177_vm8 = vcmp.eq.s32.totalorder %v39_v39, %v413_v33  ;;  %vm60_vm9 = vcmp.eq.s32.totalorder %v39_v39, %v419_v37  ;;  %vm178_vm10 = vcmp.eq.s32.totalorder %v40_v44, %v413_v33  ;;  %vm61_vm11 = vcmp.eq.s32.totalorder %v40_v44, %v419_v37 }
   0xa   :  { %198 = vperm.xlu1 %326, %v20_v4   ;;  %84 = vperm.xlu0 %325, %v20_v4   ;;  %vm179_vm12 = vcmp.eq.s32.totalorder %v41_v45, %v413_v33  ;;  %vm62_vm13 = vcmp.eq.s32.totalorder %v41_v45, %v419_v37  ;;  %vm180_vm14 = vcmp.eq.s32.totalorder %v42_v55, %v413_v33 }
   0xb   :  { %vm63_vm15 = vcmp.eq.s32.totalorder %v42_v55, %v419_v37 }
   0xe   :  { %202 = vperm.xlu1 %326, %v21_v5   ;;  %89 = vperm.xlu0 %325, %v21_v5   ;;  %v44_v5 = vadd.s32 72, %v407_v29 }
  0x12   :  { %206 = vperm.xlu1 %326, %v22_v6   ;;  %94 = vperm.xlu0 %325, %v22_v6  }
  0x16   :  { %210 = vperm.xlu1 %326, %v23_v7   ;;  %99 = vperm.xlu0 %325, %v23_v7  }
  0x1a   :  { %214 = vperm.xlu1 %326, %v24_v8   ;;  %104 = vperm.xlu0 %325, %v24_v8   ;;  %v45_v8 = vadd.s32 80, %v407_v29 }
  0x1e   :  { %218 = vperm.xlu1 %326, %v25_v9   ;;  %109 = vperm.xlu0 %325, %v25_v9  }
  0x22   :  { %222 = vperm.xlu1 %326, %v26_v10   ;;  %114 = vperm.xlu0 %325, %v26_v10  }
  0x26   :  { %226 = vperm.xlu1 %326, %v27_v11   ;;  %119 = vperm.xlu0 %325, %v27_v11  }
  0x2a   :  { %230 = vperm.xlu1 %326, %v28_v12   ;;  %124 = vperm.xlu0 %325, %v28_v12  }
  0x2e   :  { %234 = vperm.xlu1 %326, %v29_v13   ;;  %129 = vperm.xlu0 %325, %v29_v13  }
  0x32   :  { %238 = vperm.xlu1 %326, %v30_v14   ;;  %134 = vperm.xlu0 %325, %v30_v14  }
  0x36   :  { %242 = vperm.xlu1 %326, %v31_v15   ;;  %139 = vperm.xlu0 %325, %v31_v15   ;;  %v46_v15 = vadd.s32 88, %v407_v29 }
  0x3a   :  { %246 = vperm.xlu1 %326, %v32_v16   ;;  %144 = vperm.xlu0 %325, %v32_v16  }
  0x3e   :  { %250 = vperm.xlu1 %326, %v33_v17   ;;  %149 = vperm.xlu0 %325, %v33_v17  }
  0x42   :  { %327 = vset.pattern.permute.xlu0 %v332_v0 }
  0x81   :  { %v191_v18 = vpop.permute.xlu1 %190  ;;  %v75_v19 = vpop.permute.xlu0 %74 }
  0x82   :  { %v253_v46 = vsel %vm173_vm2, %v191_v18, 0.0  ;;  %v152_v47 = vsel %vm56_vm3, %v75_v19, 0.0  ;;  %vm182_vm2 = vcmp.eq.s32.totalorder %v44_v5, %v413_v33  ;;  %vm65_vm3 = vcmp.eq.s32.totalorder %v44_v5, %v419_v37 }
  0x83   :  { %v269_v56 = vadd.f32 %v253_v46, %v152_v47 }
  0x85   :  { %v195_v20 = vpop.permute.xlu1 %194  ;;  %v80_v21 = vpop.permute.xlu0 %79 }
  0x86   :  { %v254_v42 = vsel %vm174_vm0, %v195_v20, 0.0  ;;  %v153_v43 = vsel %vm57_vm1, %v80_v21, 0.0  ;;  %vm181_vm0 = vcmp.eq.s32.totalorder %v43_v62, %v413_v33  ;;  %vm64_vm1 = vcmp.eq.s32.totalorder %v43_v62, %v419_v37 }
  0x87   :  { %v270_v50 = vadd.f32 %v254_v42, %v153_v43 }
  0x89   :  { %v199_v22 = vpop.permute.xlu1 %198  ;;  %v85_v23 = vpop.permute.xlu0 %84  ;;  %v285_v60 = vadd.f32 %v270_v50, %v269_v56 }
  0x8a   :  { %v255_v48 = vsel %vm175_vm4, %v199_v22, 0.0  ;;  %v154_v49 = vsel %vm58_vm5, %v85_v23, 0.0  ;;  %vm183_vm4 = vcmp.eq.s32.totalorder %v45_v8, %v413_v33  ;;  %vm66_vm5 = vcmp.eq.s32.totalorder %v45_v8, %v419_v37 }
  0x8b   :  { %v271_v57 = vadd.f32 %v255_v48, %v154_v49 }
  0x8d   :  { %v203_v24 = vpop.permute.xlu1 %202  ;;  %v90_v25 = vpop.permute.xlu0 %89  ;;  %v286_v3 = vadd.f32 %v285_v60, %v271_v57 }
  0x8e   :  { %v256_v53 = vsel %vm176_vm6, %v203_v24, 0.0  ;;  %v155_v54 = vsel %vm59_vm7, %v90_v25, 0.0  ;;  %v47_v24 = vadd.s32 96, %v407_v29  ;;  %vm184_vm6 = vcmp.eq.s32.totalorder %v46_v15, %v413_v33 }
  0x8f   :  { %v272_v61 = vadd.f32 %v256_v53, %v155_v54  ;;  %vm67_vm7 = vcmp.eq.s32.totalorder %v46_v15, %v419_v37  ;;  %v50_v54 = vadd.s32 120, %v407_v29 }
  0x91   :  { %v207_v27 = vpop.permute.xlu1 %206  ;;  %v95_v28 = vpop.permute.xlu0 %94  ;;  %v287_v9 = vadd.f32 %v286_v3, %v272_v61 }
  0x92   :  { %v257_v58 = vsel %vm177_vm8, %v207_v27, 0.0  ;;  %v156_v59 = vsel %vm60_vm9, %v95_v28, 0.0  ;;  %vm185_vm8 = vcmp.eq.s32.totalorder %v47_v24, %v413_v33  ;;  %vm68_vm9 = vcmp.eq.s32.totalorder %v47_v24, %v419_v37 }
  0x93   :  { %v273_v4 = vadd.f32 %v257_v58, %v156_v59 }
  0x95   :  { %v211_v30 = vpop.permute.xlu1 %210  ;;  %v100_v31 = vpop.permute.xlu0 %99  ;;  %v288_v16 = vadd.f32 %v287_v9, %v273_v4 }
  0x96   :  { %v258_v1 = vsel %vm178_vm10, %v211_v30, 0.0  ;;  %v157_v2 = vsel %vm61_vm11, %v100_v31, 0.0  ;;  %v48_v30 = vadd.s32 104, %v407_v29 }
  0x97   :  { %v274_v10 = vadd.f32 %v258_v1, %v157_v2 }
  0x98   :  { %vm186_vm10 = vcmp.eq.s32.totalorder %v48_v30, %v413_v33  ;;  %vm69_vm11 = vcmp.eq.s32.totalorder %v48_v30, %v419_v37 }
  0x99   :  { %v215_v35 = vpop.permute.xlu1 %214  ;;  %v105_v36 = vpop.permute.xlu0 %104  ;;  %v289_v20 = vadd.f32 %v288_v16, %v274_v10 }
  0x9a   :  { %v259_v6 = vsel %vm179_vm12, %v215_v35, 0.0  ;;  %v158_v7 = vsel %vm62_vm13, %v105_v36, 0.0 }
  0x9b   :  { %v275_v17 = vadd.f32 %v259_v6, %v158_v7 }
  0x9d   :  { %v219_v40 = vpop.permute.xlu1 %218  ;;  %v110_v41 = vpop.permute.xlu0 %109  ;;  %v290_v27 = vadd.f32 %v289_v20, %v275_v17 }
  0x9e   :  { %v260_v13 = vsel %vm180_vm14, %v219_v40, 0.0  ;;  %v159_v14 = vsel %vm63_vm15, %v110_v41, 0.0  ;;  %v49_v41 = vadd.s32 112, %v407_v29  ;;  %vm188_vm14 = vcmp.eq.s32.totalorder %v50_v54, %v413_v33 }
  0x9f   :  { %v276_v21 = vadd.f32 %v260_v13, %v159_v14  ;;  %vm71_vm15 = vcmp.eq.s32.totalorder %v50_v54, %v419_v37 }
  0xa0   :  { %vm187_vm12 = vcmp.eq.s32.totalorder %v49_v41, %v413_v33  ;;  %vm70_vm13 = vcmp.eq.s32.totalorder %v49_v41, %v419_v37 }
  0xa1   :  { %v223_v51 = vpop.permute.xlu1 %222  ;;  %v115_v52 = vpop.permute.xlu0 %114  ;;  %v291_v34 = vadd.f32 %v290_v27, %v276_v21 }
  0xa2   :  { %v261_v18 = vsel %vm181_vm0, %v223_v51, 0.0  ;;  %v160_v19 = vsel %vm64_vm1, %v115_v52, 0.0 }
  0xa3   :  { %v277_v28 = vadd.f32 %v261_v18, %v160_v19 }
  0xa5   :  { %v227_v63 = vpop.permute.xlu1 %226  ;;  %v120_v0 = vpop.permute.xlu0 %119  ;;  %v292_v42 = vadd.f32 %v291_v34, %v277_v28 }
  0xa6   :  { %v262_v25 = vsel %vm182_vm2, %v227_v63, 0.0  ;;  %v161_v26 = vsel %vm65_vm3, %v120_v0, 0.0 }
  0xa7   :  { %v278_v35 = vadd.f32 %v262_v25, %v161_v26 }
  0xa9   :  { %v231_v11 = vpop.permute.xlu1 %230  ;;  %v125_v12 = vpop.permute.xlu0 %124  ;;  %v293_v46 = vadd.f32 %v292_v42, %v278_v35 }
  0xaa   :  { %v263_v31 = vsel %vm183_vm4, %v231_v11, 0.0  ;;  %v162_v32 = vsel %vm66_vm5, %v125_v12, 0.0  ;;  %v307_v11 = vstv %s477_s3 }
  0xab   :  { %v279_v43 = vadd.f32 %v263_v31, %v162_v32 }
  0xad   :  { %v235_v22 = vpop.permute.xlu1 %234  ;;  %v130_v23 = vpop.permute.xlu0 %129  ;;  %v294_v52 = vadd.f32 %v293_v46, %v279_v43 }
  0xae   :  { %v264_v39 = vsel %vm184_vm6, %v235_v22, 0.0  ;;  %v163_v40 = vsel %vm67_vm7, %v130_v23, 0.0 }
  0xaf   :  { %v280_v47 = vadd.f32 %v264_v39, %v163_v40 }
  0xb1   :  { %v239_v36 = vpop.permute.xlu1 %238  ;;  %v135_v38 = vpop.permute.xlu0 %134  ;;  %v295_v55 = vadd.f32 %v294_v52, %v280_v47 }
  0xb2   :  { %v265_v44 = vsel %vm185_vm8, %v239_v36, 0.0  ;;  %v164_v45 = vsel %vm68_vm9, %v135_v38, 0.0 }
  0xb3   :  { %v281_v53 = vadd.f32 %v265_v44, %v164_v45 }
  0xb5   :  { %v243_v48 = vpop.permute.xlu1 %242  ;;  %v140_v49 = vpop.permute.xlu0 %139  ;;  %v296_v61 = vadd.f32 %v295_v55, %v281_v53 }
  0xb6   :  { %v266_v50 = vsel %vm186_vm10, %v243_v48, 0.0  ;;  %v165_v51 = vsel %vm69_vm11, %v140_v49, 0.0 }
  0xb7   :  { %v282_v56 = vadd.f32 %v266_v50, %v165_v51 }
  0xb9   :  { %v247_v57 = vpop.permute.xlu1 %246  ;;  %v145_v58 = vpop.permute.xlu0 %144  ;;  %v297_v63 = vadd.f32 %v296_v61, %v282_v56 }
  0xba   :  { %v267_v59 = vsel %vm187_vm12, %v247_v57, 0.0  ;;  %v166_v60 = vsel %vm70_vm13, %v145_v58, 0.0 }
  0xbb   :  { %v283_v62 = vadd.f32 %v267_v59, %v166_v60 }
  0xbd   :  { %v251_v0 = vpop.permute.xlu1 %250  ;;  %v150_v1 = vpop.permute.xlu0 %149  ;;  %v298_v4 = vadd.f32 %v297_v63, %v283_v62 }
  0xbe   :  { %v268_v2 = vsel %vm188_vm14, %v251_v0, 0.0  ;;  %v167_v3 = vsel %vm71_vm15, %v150_v1, 0.0 }
  0xbf   :  { %v284_v5 = vadd.f32 %v268_v2, %v167_v3 }
  0xc1   :  { %v299_v29 = vadd.f32 %v298_v4, %v284_v5 }
  0xc3   :  { %v300_v6 = vrot.slane %v299_v29, 4 }
  0xc5   :  { %v301_v7 = vadd.f32 %v300_v6, %v299_v29 }
  0xc7   :  { %v302_v8 = vrot.slane %v301_v7, 2 }
  0xc9   :  { %v303_v9 = vadd.f32 %v302_v8, %v301_v7 }
  0xcb   :  { %v304_v10 = vrot.slane %v303_v9, 1 }
  0xcd   :  { %v305_v33 = vadd.f32 %v304_v10, %v303_v9 }
  0xcf   :  { %v308_v12 = vadd.f32 %v307_v11, %v305_v33 }
  0xd1   :  { %v322_v37 = vmul.f32 -1.442695, %v308_v12 }
  0xd3   :  { %328 = vpow2.f32 %v322_v37 }
  0xdd   :  { %v329_v13 = vpop.eup %328 }
  0xde   :  { %v312_v14 = vadd.f32 1.0, %v329_v13 }
  0xe0   :  { %330 = vrcp.f32 %v312_v14 }
  0xea   :  { %v331_v15 = vpop.eup %330 }
  0xeb   :  { %315 = vst [vmem:[%s478_s4] sm:$0x1] %v331_v15 }

// kernel: gcn_link_predictor_forward.3
= control target key start
LH: loop header
LB: loop body
LE: loop exit
PB: predicated region body
PF: predicated region fallthrough
CT: control target
= control target key end

     0   :  { %vm120_vm0 = vcmask 1041408   ;;  %vm95_vm1 = vcmask 31744   ;;  %s903_s2 = inlined_call_operand.vmem [shape: bf16[4,128], index: 2, kind: input, shape index: {}]   ;;  %s904_s1 = inlined_call_operand.vmem [shape: bf16[128,4], index: 1, kind: input, shape index: {}]   ;;  %s905_s0 = inlined_call_operand.vmem [shape: bf16[128,128], index: 0, kind: input, shape index: {}]   ;;  %s906_s3 = inlined_call_operand.vmem [shape: f32[1,128], index: 3, kind: input, shape index: {}]   ;;  %s907_s4 = inlined_call_operand.vmem [shape: bf16[128,128], index: 4, kind: output, shape index: {}]  }
   0x1   :  { %v54_v0 = vld [vmem:[%s903_s2] sm:$0x3]  ;;  %v777_v3 = vld [vmem:[%s904_s1 + $0x8] sm:$0xff]   ;;  %v778_v4 = vld [vmem:[%s904_s1 + $0x10] sm:$0xff]  }
   0x2   :  { %775 = vmatprep.subr.msk.bf16.mxu0 %vm120_vm0, %v54_v0  ;;  %v122_v1 = vsel %vm120_vm0, %v54_v0, 0  ;;  %v776_v2 = vld [vmem:[%s904_s1] sm:$0xff]   ;;  %v779_v5 = vld [vmem:[%s904_s1 + $0x18] sm:$0xff]   ;;  %v781_v7 = vld [vmem:[%s904_s1 + $0x28] sm:$0xff]  }
   0x3   :  { %710 = vmatpush3.bf16.msra.mxu0 %v122_v1  ;;  %711 = vmatprep.mubr.msk.bf16.mxu0 %vm95_vm1, %v776_v2  ;;  %v780_v6 = vld [vmem:[%s904_s1 + $0x20] sm:$0xff]   ;;  %v782_v8 = vld [vmem:[%s904_s1 + $0x30] sm:$0xff]   ;;  %v783_v9 = vld [vmem:[%s904_s1 + $0x38] sm:$0xff]  }
   0x4   :  { %v784_v10 = vld [vmem:[%s905_s0 + $0x10] sm:$0xff]   ;;  %v788_v11 = vld [vmem:[%s905_s0] sm:$0xff]   ;;  %v785_v36 = vld [vmem:[%s905_s0 + $0x18] sm:$0xff]  }
   0x5   :  { %747 = vmatprep.mubr.bf16.mxu1 %v784_v10  ;;  %v789_v37 = vld [vmem:[%s905_s0 + $0x8] sm:$0xff]   ;;  %v786_v38 = vld [vmem:[%s905_s0 + $0x20] sm:$0xff]   ;;  %v790_v40 = vld [vmem:[%s905_s0 + $0x30] sm:$0xff]  }
   0x6   :  { %712 = vmatmul.mubr.msk.bf16.vlgmr.msra.gmra.mrb[0].mxu0 %vm95_vm1, %v777_v3  ;;  %v787_v39 = vld [vmem:[%s905_s0 + $0x28] sm:$0xff]   ;;  %v791_v41 = vld [vmem:[%s905_s0 + $0x38] sm:$0xff]   ;;  %v604_v42 = vld [vmem:[%s906_s3] ss:$0 sm:$0xff] }
   0x7   :  { %715 = vmatprep.mubr.msk.bf16.mxu0 %vm95_vm1, %v778_v4 }
   0xe   :  { %716 = vmatmul.mubr.msk.bf16.gmra.mrb[4].mxu0 %vm95_vm1, %v779_v5 }
   0xf   :  { %719 = vmatprep.mubr.msk.bf16.mxu0 %vm95_vm1, %v780_v6 }
  0x16   :  { %720 = vmatmul.mubr.msk.bf16.gmra.mrb[8].mxu0 %vm95_vm1, %v781_v7 }
  0x17   :  { %723 = vmatprep.mubr.msk.bf16.mxu0 %vm95_vm1, %v782_v8 }
  0x1e   :  { %724 = vmatmul.mubr.msk.bf16.gmra.mrb[12].mxu0 %vm95_vm1, %v783_v9 }
  0x1f   :  { %743 = vmatprep.mubr.bf16.mxu0 %v788_v11 }
  0xd9   :  { %v713_v12 = vpop.f32.mrb[0].mxu0 }
  0xda   :  { %v158_v13 = vpop.f32.mrb[1].mxu0 }
  0xdb   :  { %v714_v14 = vpop.f32.mrb[2].mxu0 }
  0xdc   :  { %v254_v15 = vpack.c.bf16 %v714_v14, %v713_v12  ;;  %v161_v16 = vpop.f32.mrb[3].mxu0 }
  0xdd   :  { %v253_v17 = vpack.c.bf16 %v161_v16, %v158_v13 }
  0xdf   :  { %727 = vmatprep.subr.bf16.mxu0 %v253_v17  ;;  %759 = vmatprep.subr.bf16.mxu1 %v253_v17 }
  0xe0   :  { %728 = vmatpush3.bf16.msra.mxu0 %v253_v17  ;;  %767 = vmatpush3.bf16.msra.mxu1 %v253_v17 }
  0xe1   :  { %v717_v18 = vpop.f32.mrb[4].mxu0  ;;  %729 = vmatprep.subr.bf16.mxu0 %v254_v15  ;;  %760 = vmatprep.subr.bf16.mxu1 %v254_v15 }
  0xe2   :  { %v174_v19 = vpop.f32.mrb[5].mxu0 }
  0xe3   :  { %v718_v20 = vpop.f32.mrb[6].mxu0 }
  0xe4   :  { %v256_v21 = vpack.c.bf16 %v718_v20, %v717_v18  ;;  %v177_v22 = vpop.f32.mrb[7].mxu0  ;;  %730 = vmatpush3.bf16.msra.mxu0 %v254_v15  ;;  %768 = vmatpush3.bf16.msra.mxu1 %v254_v15 }
  0xe5   :  { %v255_v23 = vpack.c.bf16 %v177_v22, %v174_v19 }
  0xe7   :  { %731 = vmatprep.subr.bf16.mxu0 %v255_v23  ;;  %761 = vmatprep.subr.bf16.mxu1 %v255_v23 }
  0xe8   :  { %732 = vmatpush3.bf16.msra.mxu0 %v255_v23  ;;  %769 = vmatpush3.bf16.msra.mxu1 %v255_v23 }
  0xe9   :  { %v721_v24 = vpop.f32.mrb[8].mxu0  ;;  %733 = vmatprep.subr.bf16.mxu0 %v256_v21  ;;  %762 = vmatprep.subr.bf16.mxu1 %v256_v21 }
  0xea   :  { %v190_v25 = vpop.f32.mrb[9].mxu0 }
  0xeb   :  { %v722_v26 = vpop.f32.mrb[10].mxu0 }
  0xec   :  { %v258_v27 = vpack.c.bf16 %v722_v26, %v721_v24  ;;  %v193_v28 = vpop.f32.mrb[11].mxu0  ;;  %734 = vmatpush3.bf16.msra.mxu0 %v256_v21  ;;  %770 = vmatpush3.bf16.msra.mxu1 %v256_v21 }
  0xed   :  { %v257_v29 = vpack.c.bf16 %v193_v28, %v190_v25 }
  0xef   :  { %735 = vmatprep.subr.bf16.mxu0 %v257_v29  ;;  %763 = vmatprep.subr.bf16.mxu1 %v257_v29 }
  0xf0   :  { %736 = vmatpush3.bf16.msra.mxu0 %v257_v29  ;;  %771 = vmatpush3.bf16.msra.mxu1 %v257_v29 }
  0xf1   :  { %v725_v30 = vpop.f32.mrb[12].mxu0  ;;  %737 = vmatprep.subr.bf16.mxu0 %v258_v27  ;;  %764 = vmatprep.subr.bf16.mxu1 %v258_v27 }
  0xf2   :  { %v206_v31 = vpop.f32.mrb[13].mxu0 }
  0xf3   :  { %v726_v32 = vpop.f32.mrb[14].mxu0 }
  0xf4   :  { %v260_v33 = vpack.c.bf16 %v726_v32, %v725_v30  ;;  %v209_v34 = vpop.f32.mrb[15].mxu0  ;;  %738 = vmatpush3.bf16.msra.mxu0 %v258_v27  ;;  %772 = vmatpush3.bf16.msra.mxu1 %v258_v27 }
  0xf5   :  { %v259_v35 = vpack.c.bf16 %v209_v34, %v206_v31 }
  0xf7   :  { %739 = vmatprep.subr.bf16.mxu0 %v259_v35  ;;  %765 = vmatprep.subr.bf16.mxu1 %v259_v35 }
  0xf8   :  { %740 = vmatpush3.bf16.msra.mxu0 %v259_v35  ;;  %773 = vmatpush3.bf16.msra.mxu1 %v259_v35 }
  0xf9   :  { %741 = vmatprep.subr.bf16.mxu0 %v260_v33  ;;  %766 = vmatprep.subr.bf16.mxu1 %v260_v33 }
  0xfc   :  { %742 = vmatpush3.bf16.msra.mxu0 %v260_v33  ;;  %774 = vmatpush3.bf16.msra.mxu1 %v260_v33 }
  0xff   :  { %748 = vmatmul.mubr.bf16.vlgmr.msra.gmra.mrb[0].mxu1 %v785_v36  ;;  %744 = vmatmul.mubr.bf16.vlgmr.msra.gmra.mrb[16].mxu0 %v789_v37 }
 0x100   :  { %751 = vmatprep.mubr.bf16.mxu1 %v786_v38 }
 0x107   :  { %752 = vmatmul.mubr.bf16.gmra.mrb[4].mxu1 %v787_v39 }
 0x108   :  { %755 = vmatprep.mubr.bf16.mxu1 %v790_v40 }
 0x10f   :  { %756 = vmatmul.mubr.bf16.gmra.mrb[8].mxu1 %v791_v41 }
 0x1d2   :  { %v749_v43 = vpop.f32.mrb[0].mxu1  ;;  %v745_v44 = vpop.f32.mrb[16].mxu0 }
 0x1d3   :  { %v470_v45 = vadd.f32 %v749_v43, %v604_v42  ;;  %v359_v46 = vpop.f32.mrb[1].mxu1  ;;  %v466_v47 = vadd.f32 %v745_v44, %v604_v42  ;;  %v343_v48 = vpop.f32.mrb[17].mxu0 }
 0x1d4   :  { %v468_v49 = vadd.f32 %v604_v42, %v359_v46  ;;  %v750_v50 = vpop.f32.mrb[2].mxu1  ;;  %v464_v51 = vadd.f32 %v604_v42, %v343_v48  ;;  %v746_v52 = vpop.f32.mrb[18].mxu0 }
 0x1d5   :  { %v471_v53 = vadd.f32 %v750_v50, %v604_v42  ;;  %v362_v54 = vpop.f32.mrb[3].mxu1  ;;  %v482_v55 = vmax.f32 %v466_v47, 0.0  ;;  %v467_v56 = vadd.f32 %v746_v52, %v604_v42  ;;  %v346_v57 = vpop.f32.mrb[19].mxu0  ;;  %v486_v61 = vmax.f32 %v470_v45, 0.0 }
 0x1d6   :  { %v469_v58 = vadd.f32 %v604_v42, %v362_v54  ;;  %v480_v59 = vmax.f32 %v464_v51, 0.0  ;;  %v465_v60 = vadd.f32 %v604_v42, %v346_v57  ;;  %v484_v0 = vmax.f32 %v468_v49, 0.0 }
 0x1d7   :  { %v487_v62 = vmax.f32 %v471_v53, 0.0  ;;  %v483_v63 = vmax.f32 %v467_v56, 0.0 }
 0x1d8   :  { %v485_v1 = vmax.f32 %v469_v58, 0.0  ;;  %v481_v2 = vmax.f32 %v465_v60, 0.0 }
 0x1d9   :  { %v655_v3 = vpack.c.bf16 %v487_v62, %v486_v61  ;;  %v645_v4 = vpack.c.bf16 %v483_v63, %v482_v55 }
 0x1da   :  { %v650_v5 = vpack.c.bf16 %v485_v1, %v484_v0  ;;  %v753_v6 = vpop.f32.mrb[4].mxu1  ;;  %v640_v7 = vpack.c.bf16 %v481_v2, %v480_v59 }
 0x1db   :  { %679 = vst [vmem:[%s907_s4 + $0x18] sm:$0xff] %v655_v3   ;;  %v474_v8 = vadd.f32 %v753_v6, %v604_v42  ;;  %v375_v9 = vpop.f32.mrb[5].mxu1  ;;  %677 = vst [vmem:[%s907_s4 + $0x8] sm:$0xff] %v645_v4  }
 0x1dc   :  { %678 = vst [vmem:[%s907_s4 + $0x10] sm:$0xff] %v650_v5   ;;  %v472_v10 = vadd.f32 %v604_v42, %v375_v9  ;;  %v754_v11 = vpop.f32.mrb[6].mxu1  ;;  %641 = vst [vmem:[%s907_s4] sm:$0xff] %v640_v7  }
 0x1dd   :  { %v475_v12 = vadd.f32 %v754_v11, %v604_v42  ;;  %v378_v13 = vpop.f32.mrb[7].mxu1  ;;  %v490_v15 = vmax.f32 %v474_v8, 0.0 }
 0x1de   :  { %v473_v14 = vadd.f32 %v604_v42, %v378_v13  ;;  %v488_v17 = vmax.f32 %v472_v10, 0.0 }
 0x1df   :  { %v491_v16 = vmax.f32 %v475_v12, 0.0 }
 0x1e0   :  { %v489_v18 = vmax.f32 %v473_v14, 0.0 }
 0x1e1   :  { %v665_v19 = vpack.c.bf16 %v491_v16, %v490_v15 }
 0x1e2   :  { %v660_v20 = vpack.c.bf16 %v489_v18, %v488_v17  ;;  %v757_v21 = vpop.f32.mrb[8].mxu1 }
 0x1e3   :  { %681 = vst [vmem:[%s907_s4 + $0x28] sm:$0xff] %v665_v19   ;;  %v478_v22 = vadd.f32 %v757_v21, %v604_v42  ;;  %v391_v23 = vpop.f32.mrb[9].mxu1 }
 0x1e4   :  { %680 = vst [vmem:[%s907_s4 + $0x20] sm:$0xff] %v660_v20   ;;  %v476_v24 = vadd.f32 %v604_v42, %v391_v23  ;;  %v758_v25 = vpop.f32.mrb[10].mxu1 }
 0x1e5   :  { %v479_v26 = vadd.f32 %v758_v25, %v604_v42  ;;  %v394_v27 = vpop.f32.mrb[11].mxu1  ;;  %v494_v29 = vmax.f32 %v478_v22, 0.0 }
 0x1e6   :  { %v477_v28 = vadd.f32 %v604_v42, %v394_v27  ;;  %v492_v31 = vmax.f32 %v476_v24, 0.0 }
 0x1e7   :  { %v495_v30 = vmax.f32 %v479_v26, 0.0 }
 0x1e8   :  { %v493_v32 = vmax.f32 %v477_v28, 0.0 }
 0x1e9   :  { %v675_v33 = vpack.c.bf16 %v495_v30, %v494_v29 }
 0x1ea   :  { %v670_v34 = vpack.c.bf16 %v493_v32, %v492_v31 }
 0x1eb   :  { %683 = vst [vmem:[%s907_s4 + $0x38] sm:$0xff] %v675_v33  }
 0x1ec   :  { %682 = vst [vmem:[%s907_s4 + $0x30] sm:$0xff] %v670_v34  }

// kernel: gcn_link_predictor_forward.4
= control target key start
LH: loop header
LB: loop body
LE: loop exit
PB: predicated region body
PF: predicated region fallthrough
CT: control target
= control target key end

     0   :  { %vm694_vm0 = vcmask 15360   ;;  %s1163_s2 = inlined_call_operand.vmem [shape: bf16[128,128], index: 2, kind: input, shape index: {}]   ;;  %s1164_s1 = inlined_call_operand.vmem [shape: bf16[128,128], index: 1, kind: input, shape index: {}]   ;;  %s1165_s0 = inlined_call_operand.vmem [shape: bf16[128,128], index: 0, kind: input, shape index: {}]   ;;  %s1166_s4 = inlined_call_operand.vmem [shape: bf16[128,2], index: 4, kind: input, shape index: {}]   ;;  %s1167_s3 = inlined_call_operand.vmem [shape: f32[1,128], index: 3, kind: input, shape index: {}]   ;;  %s1168_s5 = inlined_call_operand.vmem [shape: f32[128,2], index: 5, kind: output, shape index: {}]  }
   0x1   :  { %v908_v0 = vld [vmem:[%s1163_s2] sm:$0xff]   ;;  %v909_v1 = vld [vmem:[%s1163_s2 + $0x8] sm:$0xff]   ;;  %v910_v2 = vld [vmem:[%s1163_s2 + $0x10] sm:$0xff]  }
   0x2   :  { %796 = vmatprep.subr.bf16.mxu0 %v908_v0  ;;  %v911_v3 = vld [vmem:[%s1163_s2 + $0x18] sm:$0xff]   ;;  %v916_v4 = vld [vmem:[%s1164_s1] sm:$0xff]   ;;  %v913_v6 = vld [vmem:[%s1163_s2 + $0x28] sm:$0xff]  }
   0x3   :  { %797 = vmatpush3.bf16.msra.mxu0 %v908_v0  ;;  %812 = vmatprep.mubr.bf16.mxu0 %v916_v4  ;;  %v912_v5 = vld [vmem:[%s1163_s2 + $0x20] sm:$0xff]   ;;  %v914_v7 = vld [vmem:[%s1163_s2 + $0x30] sm:$0xff]   ;;  %v915_v8 = vld [vmem:[%s1163_s2 + $0x38] sm:$0xff]  }
   0x4   :  { %798 = vmatprep.subr.bf16.mxu0 %v909_v1  ;;  %v917_v9 = vld [vmem:[%s1164_s1 + $0x8] sm:$0xff]   ;;  %v918_v10 = vld [vmem:[%s1164_s1 + $0x10] sm:$0xff]   ;;  %v919_v11 = vld [vmem:[%s1164_s1 + $0x18] sm:$0xff]  }
   0x5   :  { %v920_v12 = vld [vmem:[%s1164_s1 + $0x20] sm:$0xff]   ;;  %v921_v13 = vld [vmem:[%s1164_s1 + $0x28] sm:$0xff]   ;;  %v922_v14 = vld [vmem:[%s1164_s1 + $0x30] sm:$0xff]  }
   0x6   :  { %v923_v15 = vld [vmem:[%s1164_s1 + $0x38] sm:$0xff]   ;;  %v924_v16 = vld [vmem:[%s1165_s0] sm:$0xff]   ;;  %v1027_v18 = vld [vmem:[%s1166_s4 + $0x8] sm:$0xff]  }
   0x7   :  { %799 = vmatpush3.bf16.msra.mxu0 %v909_v1  ;;  %844 = vmatprep.mubr.bf16.mxu1 %v924_v16  ;;  %v932_v17 = vld [vmem:[%s1166_s4] sm:$0xff]   ;;  %v1033_v19 = vld [vmem:[%s1166_s4 + $0x10] sm:$0xff]   ;;  %v1040_v20 = vld [vmem:[%s1166_s4 + $0x18] sm:$0xff]  }
   0x8   :  { %800 = vmatprep.subr.bf16.mxu0 %v910_v2  ;;  %v1047_v21 = vld [vmem:[%s1166_s4 + $0x20] sm:$0xff]   ;;  %v1054_v22 = vld [vmem:[%s1166_s4 + $0x28] sm:$0xff]   ;;  %v926_v48 = vld [vmem:[%s1165_s0 + $0x10] sm:$0xff]  }
   0x9   :  { %v925_v47 = vld [vmem:[%s1165_s0 + $0x8] sm:$0xff]   ;;  %v927_v49 = vld [vmem:[%s1165_s0 + $0x18] sm:$0xff]   ;;  %v928_v50 = vld [vmem:[%s1165_s0 + $0x20] sm:$0xff]  }
   0xa   :  { %v929_v51 = vld [vmem:[%s1165_s0 + $0x28] sm:$0xff]   ;;  %v930_v52 = vld [vmem:[%s1165_s0 + $0x30] sm:$0xff]   ;;  %v931_v53 = vld [vmem:[%s1165_s0 + $0x38] sm:$0xff]  }
   0xb   :  { %801 = vmatpush3.bf16.msra.mxu0 %v910_v2  ;;  %v938_v54 = vld [vmem:[%s1166_s4 + $0x30] sm:$0xff]   ;;  %v939_v55 = vld [vmem:[%s1166_s4 + $0x38] sm:$0xff]   ;;  %v739_v57 = vld [vmem:[%s1167_s3] ss:$0 sm:$0xff] }
   0xc   :  { %802 = vmatprep.subr.bf16.mxu0 %v911_v3 }
   0xf   :  { %803 = vmatpush3.bf16.msra.mxu0 %v911_v3 }
  0x10   :  { %804 = vmatprep.subr.bf16.mxu0 %v912_v5 }
  0x13   :  { %805 = vmatpush3.bf16.msra.mxu0 %v912_v5 }
  0x14   :  { %806 = vmatprep.subr.bf16.mxu0 %v913_v6 }
  0x17   :  { %807 = vmatpush3.bf16.msra.mxu0 %v913_v6 }
  0x18   :  { %808 = vmatprep.subr.bf16.mxu0 %v914_v7 }
  0x1b   :  { %809 = vmatpush3.bf16.msra.mxu0 %v914_v7 }
  0x1c   :  { %810 = vmatprep.subr.bf16.mxu0 %v915_v8 }
  0x1f   :  { %811 = vmatpush3.bf16.msra.mxu0 %v915_v8 }
  0x20   :  { %860 = vmatprep.subr.bf16.mxu0 %v932_v17 }
  0x22   :  { %813 = vmatmul.mubr.bf16.vlgmr.msra.gmra.mrb[0].mxu0 %v917_v9 }
  0x23   :  { %816 = vmatprep.mubr.bf16.mxu0 %v918_v10  ;;  %861 = vmatpush3.bf16.msra.mxu0 %v932_v17 }
  0x24   :  { %862 = vmatprep.subr.bf16.mxu0 %v1027_v18 }
  0x27   :  { %863 = vmatpush3.bf16.msra.mxu0 %v1027_v18 }
  0x28   :  { %864 = vmatprep.subr.bf16.mxu0 %v1033_v19 }
  0x2a   :  { %817 = vmatmul.mubr.bf16.gmra.mrb[4].mxu0 %v919_v11 }
  0x2b   :  { %820 = vmatprep.mubr.bf16.mxu0 %v920_v12  ;;  %865 = vmatpush3.bf16.msra.mxu0 %v1033_v19 }
  0x2c   :  { %866 = vmatprep.subr.bf16.mxu0 %v1040_v20 }
  0x2f   :  { %867 = vmatpush3.bf16.msra.mxu0 %v1040_v20 }
  0x30   :  { %868 = vmatprep.subr.bf16.mxu0 %v1047_v21 }
  0x32   :  { %821 = vmatmul.mubr.bf16.gmra.mrb[8].mxu0 %v921_v13 }
  0x33   :  { %824 = vmatprep.mubr.bf16.mxu0 %v922_v14  ;;  %869 = vmatpush3.bf16.msra.mxu0 %v1047_v21 }
  0x34   :  { %870 = vmatprep.subr.bf16.mxu0 %v1054_v22 }
  0x37   :  { %871 = vmatpush3.bf16.msra.mxu0 %v1054_v22 }
  0x38   :  { %872 = vmatprep.subr.bf16.mxu0 %v938_v54 }
  0x3a   :  { %825 = vmatmul.mubr.bf16.gmra.mrb[12].mxu0 %v923_v15 }
  0x3b   :  { %873 = vmatpush3.bf16.msra.mxu0 %v938_v54 }
  0x3c   :  { %874 = vmatprep.subr.bf16.mxu0 %v939_v55 }
  0x3f   :  { %875 = vmatpush3.bf16.msra.mxu0 %v939_v55 }
  0xf5   :  { %v814_v23 = vpop.f32.mrb[0].mxu0 }
  0xf6   :  { %v203_v24 = vpop.f32.mrb[1].mxu0 }
  0xf7   :  { %v815_v25 = vpop.f32.mrb[2].mxu0 }
  0xf8   :  { %v299_v26 = vpack.c.bf16 %v815_v25, %v814_v23  ;;  %v206_v27 = vpop.f32.mrb[3].mxu0 }
  0xf9   :  { %v298_v28 = vpack.c.bf16 %v206_v27, %v203_v24 }
  0xfb   :  { %828 = vmatprep.subr.bf16.mxu1 %v298_v28 }
  0xfc   :  { %829 = vmatpush3.bf16.msra.mxu1 %v298_v28 }
  0xfd   :  { %v818_v29 = vpop.f32.mrb[4].mxu0  ;;  %830 = vmatprep.subr.bf16.mxu1 %v299_v26 }
  0xfe   :  { %v219_v30 = vpop.f32.mrb[5].mxu0 }
  0xff   :  { %v819_v31 = vpop.f32.mrb[6].mxu0 }
 0x100   :  { %v301_v32 = vpack.c.bf16 %v819_v31, %v818_v29  ;;  %v222_v33 = vpop.f32.mrb[7].mxu0  ;;  %831 = vmatpush3.bf16.msra.mxu1 %v299_v26 }
 0x101   :  { %v300_v34 = vpack.c.bf16 %v222_v33, %v219_v30 }
 0x103   :  { %832 = vmatprep.subr.bf16.mxu1 %v300_v34 }
 0x104   :  { %833 = vmatpush3.bf16.msra.mxu1 %v300_v34 }
 0x105   :  { %v822_v35 = vpop.f32.mrb[8].mxu0  ;;  %834 = vmatprep.subr.bf16.mxu1 %v301_v32 }
 0x106   :  { %v235_v36 = vpop.f32.mrb[9].mxu0 }
 0x107   :  { %v823_v37 = vpop.f32.mrb[10].mxu0 }
 0x108   :  { %v303_v38 = vpack.c.bf16 %v823_v37, %v822_v35  ;;  %v238_v39 = vpop.f32.mrb[11].mxu0  ;;  %835 = vmatpush3.bf16.msra.mxu1 %v301_v32 }
 0x109   :  { %v302_v40 = vpack.c.bf16 %v238_v39, %v235_v36 }
 0x10b   :  { %836 = vmatprep.subr.bf16.mxu1 %v302_v40 }
 0x10c   :  { %837 = vmatpush3.bf16.msra.mxu1 %v302_v40 }
 0x10d   :  { %v826_v41 = vpop.f32.mrb[12].mxu0  ;;  %838 = vmatprep.subr.bf16.mxu1 %v303_v38 }
 0x10e   :  { %v251_v42 = vpop.f32.mrb[13].mxu0 }
 0x10f   :  { %v827_v43 = vpop.f32.mrb[14].mxu0 }
 0x110   :  { %v305_v44 = vpack.c.bf16 %v827_v43, %v826_v41  ;;  %v254_v45 = vpop.f32.mrb[15].mxu0  ;;  %839 = vmatpush3.bf16.msra.mxu1 %v303_v38 }
 0x111   :  { %v304_v46 = vpack.c.bf16 %v254_v45, %v251_v42 }
 0x113   :  { %840 = vmatprep.subr.bf16.mxu1 %v304_v46 }
 0x114   :  { %841 = vmatpush3.bf16.msra.mxu1 %v304_v46 }
 0x115   :  { %842 = vmatprep.subr.bf16.mxu1 %v305_v44 }
 0x118   :  { %843 = vmatpush3.bf16.msra.mxu1 %v305_v44 }
 0x119   :  { %892 = vmatprep.subr.bf16.mxu1 %v932_v17 }
 0x11b   :  { %845 = vmatmul.mubr.bf16.vlgmr.msra.gmra.mrb[0].mxu1 %v925_v47 }
 0x11c   :  { %848 = vmatprep.mubr.bf16.mxu1 %v926_v48  ;;  %900 = vmatpush3.bf16.msra.mxu1 %v932_v17 }
 0x11d   :  { %893 = vmatprep.subr.bf16.mxu1 %v1027_v18 }
 0x120   :  { %901 = vmatpush3.bf16.msra.mxu1 %v1027_v18 }
 0x121   :  { %894 = vmatprep.subr.bf16.mxu1 %v1033_v19 }
 0x123   :  { %849 = vmatmul.mubr.bf16.gmra.mrb[4].mxu1 %v927_v49 }
 0x124   :  { %852 = vmatprep.mubr.bf16.mxu1 %v928_v50  ;;  %902 = vmatpush3.bf16.msra.mxu1 %v1033_v19 }
 0x125   :  { %895 = vmatprep.subr.bf16.mxu1 %v1040_v20 }
 0x128   :  { %903 = vmatpush3.bf16.msra.mxu1 %v1040_v20 }
 0x129   :  { %896 = vmatprep.subr.bf16.mxu1 %v1047_v21 }
 0x12b   :  { %853 = vmatmul.mubr.bf16.gmra.mrb[8].mxu1 %v929_v51 }
 0x12c   :  { %856 = vmatprep.mubr.bf16.mxu1 %v930_v52  ;;  %904 = vmatpush3.bf16.msra.mxu1 %v1047_v21 }
 0x12d   :  { %897 = vmatprep.subr.bf16.mxu1 %v1054_v22 }
 0x130   :  { %905 = vmatpush3.bf16.msra.mxu1 %v1054_v22 }
 0x131   :  { %898 = vmatprep.subr.bf16.mxu1 %v938_v54 }
 0x133   :  { %857 = vmatmul.mubr.bf16.gmra.mrb[12].mxu1 %v931_v53 }
 0x134   :  { %906 = vmatpush3.bf16.msra.mxu1 %v938_v54 }
 0x135   :  { %899 = vmatprep.subr.bf16.mxu1 %v939_v55 }
 0x138   :  { %907 = vmatpush3.bf16.msra.mxu1 %v939_v55 }
 0x1ee   :  { %v846_v56 = vpop.f32.mrb[0].mxu1 }
 0x1ef   :  { %v388_v58 = vpop.f32.mrb[1].mxu1  ;;  %v511_v60 = vadd.f32 %v846_v56, %v739_v57 }
 0x1f0   :  { %v847_v59 = vpop.f32.mrb[2].mxu1  ;;  %v509_v63 = vadd.f32 %v739_v57, %v388_v58 }
 0x1f1   :  { %v512_v61 = vadd.f32 %v847_v59, %v739_v57  ;;  %v391_v62 = vpop.f32.mrb[3].mxu1 }
 0x1f2   :  { %v510_v0 = vadd.f32 %v739_v57, %v391_v62 }
 0x1f3   :  { %v526_v1 = vpack.c.bf16 %v512_v61, %v511_v60 }
 0x1f4   :  { %v525_v2 = vpack.c.bf16 %v510_v0, %v509_v63 }
 0x1f6   :  { %v850_v3 = vpop.f32.mrb[4].mxu1  ;;  %876 = vmatprep.mubr.bf16.mxu0 %v525_v2 }
 0x1f7   :  { %v404_v4 = vpop.f32.mrb[5].mxu1  ;;  %877 = vmatmul.mubr.bf16.vlgmr.msra.gmra.mrb[16].mxu0 %v526_v1  ;;  %v515_v6 = vadd.f32 %v850_v3, %v739_v57 }
 0x1f8   :  { %v851_v5 = vpop.f32.mrb[6].mxu1  ;;  %v513_v9 = vadd.f32 %v739_v57, %v404_v4 }
 0x1f9   :  { %v516_v7 = vadd.f32 %v851_v5, %v739_v57  ;;  %v407_v8 = vpop.f32.mrb[7].mxu1 }
 0x1fa   :  { %v514_v10 = vadd.f32 %v739_v57, %v407_v8 }
 0x1fb   :  { %v528_v11 = vpack.c.bf16 %v516_v7, %v515_v6 }
 0x1fc   :  { %v527_v12 = vpack.c.bf16 %v514_v10, %v513_v9 }
 0x1fe   :  { %v854_v13 = vpop.f32.mrb[8].mxu1  ;;  %880 = vmatprep.mubr.bf16.mxu0 %v527_v12 }
 0x1ff   :  { %v420_v14 = vpop.f32.mrb[9].mxu1  ;;  %881 = vmatmul.mubr.bf16.gmra.mrb[20].mxu0 %v528_v11  ;;  %v519_v16 = vadd.f32 %v854_v13, %v739_v57 }
 0x200   :  { %v855_v15 = vpop.f32.mrb[10].mxu1  ;;  %v517_v19 = vadd.f32 %v739_v57, %v420_v14 }
 0x201   :  { %v520_v17 = vadd.f32 %v855_v15, %v739_v57  ;;  %v423_v18 = vpop.f32.mrb[11].mxu1 }
 0x202   :  { %v518_v20 = vadd.f32 %v739_v57, %v423_v18 }
 0x203   :  { %v530_v21 = vpack.c.bf16 %v520_v17, %v519_v16 }
 0x204   :  { %v529_v22 = vpack.c.bf16 %v518_v20, %v517_v19 }
 0x206   :  { %v858_v23 = vpop.f32.mrb[12].mxu1  ;;  %884 = vmatprep.mubr.bf16.mxu1 %v529_v22 }
 0x207   :  { %v436_v24 = vpop.f32.mrb[13].mxu1  ;;  %885 = vmatmul.mubr.bf16.vlgmr.msra.gmra.mrb[16].mxu1 %v530_v21  ;;  %v523_v26 = vadd.f32 %v858_v23, %v739_v57 }
 0x208   :  { %v859_v25 = vpop.f32.mrb[14].mxu1  ;;  %v521_v29 = vadd.f32 %v739_v57, %v436_v24 }
 0x209   :  { %v524_v27 = vadd.f32 %v859_v25, %v739_v57  ;;  %v439_v28 = vpop.f32.mrb[15].mxu1 }
 0x20a   :  { %v522_v30 = vadd.f32 %v739_v57, %v439_v28 }
 0x20b   :  { %v532_v31 = vpack.c.bf16 %v524_v27, %v523_v26 }
 0x20c   :  { %v531_v32 = vpack.c.bf16 %v522_v30, %v521_v29 }
 0x20e   :  { %888 = vmatprep.mubr.bf16.mxu1 %v531_v32 }
 0x20f   :  { %889 = vmatmul.mubr.bf16.gmra.mrb[20].mxu1 %v532_v31 }
 0x2ca   :  { %v878_v33 = vpop.f32.mrb[16].mxu0 }
 0x2cb   :  { %697 = vst.msk [vmem:[%s1168_s5 + $0x10] sm:$0xff] %vm694_vm0, %v878_v33  ;;  %v631_v34 = vpop.f32.mrb[17].mxu0 }
 0x2cc   :  { %695 = vst.msk [vmem:[%s1168_s5] sm:$0xff] %vm694_vm0, %v631_v34  ;;  %v879_v35 = vpop.f32.mrb[18].mxu0 }
 0x2cd   :  { %698 = vst.msk [vmem:[%s1168_s5 + $0x18] sm:$0xff] %vm694_vm0, %v879_v35  ;;  %v634_v36 = vpop.f32.mrb[19].mxu0 }
 0x2ce   :  { %696 = vst.msk [vmem:[%s1168_s5 + $0x8] sm:$0xff] %vm694_vm0, %v634_v36 }
 0x2d2   :  { %v882_v37 = vpop.f32.mrb[20].mxu0 }
 0x2d3   :  { %701 = vst.msk [vmem:[%s1168_s5 + $0x30] sm:$0xff] %vm694_vm0, %v882_v37  ;;  %v647_v38 = vpop.f32.mrb[21].mxu0 }
 0x2d4   :  { %699 = vst.msk [vmem:[%s1168_s5 + $0x20] sm:$0xff] %vm694_vm0, %v647_v38  ;;  %v883_v39 = vpop.f32.mrb[22].mxu0 }
 0x2d5   :  { %702 = vst.msk [vmem:[%s1168_s5 + $0x38] sm:$0xff] %vm694_vm0, %v883_v39  ;;  %v650_v40 = vpop.f32.mrb[23].mxu0 }
 0x2d6   :  { %700 = vst.msk [vmem:[%s1168_s5 + $0x28] sm:$0xff] %vm694_vm0, %v650_v40 }
 0x2da   :  { %v886_v41 = vpop.f32.mrb[16].mxu1 }
 0x2db   :  { %705 = vst.msk [vmem:[%s1168_s5 + $0x50] sm:$0xff] %vm694_vm0, %v886_v41  ;;  %v663_v42 = vpop.f32.mrb[17].mxu1 }
 0x2dc   :  { %703 = vst.msk [vmem:[%s1168_s5 + $0x40] sm:$0xff] %vm694_vm0, %v663_v42  ;;  %v887_v43 = vpop.f32.mrb[18].mxu1 }
 0x2dd   :  { %706 = vst.msk [vmem:[%s1168_s5 + $0x58] sm:$0xff] %vm694_vm0, %v887_v43  ;;  %v666_v44 = vpop.f32.mrb[19].mxu1 }
 0x2de   :  { %704 = vst.msk [vmem:[%s1168_s5 + $0x48] sm:$0xff] %vm694_vm0, %v666_v44 }
 0x2e2   :  { %v890_v45 = vpop.f32.mrb[20].mxu1 }
 0x2e3   :  { %709 = vst.msk [vmem:[%s1168_s5 + $0x70] sm:$0xff] %vm694_vm0, %v890_v45  ;;  %v679_v46 = vpop.f32.mrb[21].mxu1 }
 0x2e4   :  { %707 = vst.msk [vmem:[%s1168_s5 + $0x60] sm:$0xff] %vm694_vm0, %v679_v46  ;;  %v891_v47 = vpop.f32.mrb[22].mxu1 }
 0x2e5   :  { %710 = vst.msk [vmem:[%s1168_s5 + $0x78] sm:$0xff] %vm694_vm0, %v891_v47  ;;  %v682_v48 = vpop.f32.mrb[23].mxu1 }
 0x2e6   :  { %708 = vst.msk [vmem:[%s1168_s5 + $0x68] sm:$0xff] %vm694_vm0, %v682_v48 }

</bundles_post_ra>
